<compile_context>
chip_gen: v7x
topology: tpu7x:2x2x1
jax: 0.10.0
libtpu: 0.0.40
codegen_flags: <defaults>
</compile_context>

<pallas_src>
import numpy as np
import jax
import jax.numpy as jnp
from jax.experimental import pallas as pl
from jax.experimental.pallas import tpu as pltpu


LANE = 128           # TPU lane width (bias tile lane padding only)
MAX_TB = 512         # max batch-tile rows (keeps DMA near roofline, VMEM tiny)
SPLIT_THRESHOLD = 128  # below this, run the whole batch as one tile


def _round_up(n, m):
    return ((n + m - 1) // m) * m


def _choose_batch_tiling(b, max_tb=MAX_TB, split_threshold=SPLIT_THRESHOLD):
    """Return (tb, bpad).

    Small batches: a single full-batch tile (block == full array dims, so no
    batch padding and one grid step -- per-step overhead dominates compute).
    Large batches: an EVEN number of 8-aligned tiles <= max_tb, so the
    'parallel' grid axis splits cleanly over v7x's 2 TensorCores and v6e/v5e
    see few, fat grid steps. Padding is at most (8*n_tiles - 1) rows.
    """
    b = max(int(b), 1)
    if b <= split_threshold:
        return b, b
    n = 2
    while (b + n - 1) // n > max_tb:
        n += 2
    tb = _round_up((b + n - 1) // n, 8)
    return tb, n * tb


# ----------------------------- Pallas kernel ------------------------------ #

def _fused_decoder_kernel(x_ref, w1_ref, w2_ref, w3_ref, b_ref, o_ref):
    """One batch tile of the full decoder: 3 matmuls + ReLU/ReLU/tanh.

    x_ref : (TB, Din)   bf16 un-padded input rows
    w1_ref: (Din, N1)   bf16 Linear weight
    w2_ref: (N1, N2)    bf16 dense Toeplitz of ConvTranspose1d #1
    w3_ref: (N2, Nout)  bf16 dense Toeplitz of ConvTranspose1d #2 (compact)
    b_ref : (8, BW)     f32; row 0 = Linear bias, row 1 = conv1 bias (per
                        (c,t)), row 2 = conv2 bias (per (c,t))
    o_ref : (TB, Nout)  bf16 compact output (valid columns only)
    """
    n1 = w1_ref.shape[1]
    n2 = w2_ref.shape[1]
    nout = w3_ref.shape[1]

    # Linear + bias + ReLU (f32 accumulate / elementwise: v5e-safe).
    h = jnp.dot(x_ref[...], w1_ref[...], preferred_element_type=jnp.float32)
    h = jnp.maximum(h + b_ref[0:1, :n1], 0.0)

    # ConvTranspose1d #1 (Toeplitz matmul) + bias + ReLU.
    h = jnp.dot(h.astype(jnp.bfloat16), w2_ref[...],
                preferred_element_type=jnp.float32)
    h = jnp.maximum(h + b_ref[1:2, :n2], 0.0)

    # ConvTranspose1d #2 (Toeplitz matmul) + bias + tanh, compact bf16 store.
    y = jnp.dot(h.astype(jnp.bfloat16), w3_ref[...],
                preferred_element_type=jnp.float32)
    o_ref[...] = jnp.tanh(y + b_ref[2:3, :nout]).astype(o_ref.dtype)


def symbol2signal_forward(x, params):
    """x: (B, 1, Din) -> (B, Cout, Lout). Mirrors Symbol2SignalConvNet.forward."""
    # torch's x.squeeze() drops every size-1 dim; squeeze only the channel axis
    # so B==1 / Din==1 corner cases keep their rank.
    xb = jnp.squeeze(x, axis=1)
    B, d_in = xb.shape

    w1, w2, w3, b123 = params["w1"], params["w2"], params["w3"], params["b123"]
    n1 = w1.shape[1]
    n2 = w2.shape[1]
    nout = w3.shape[1]
    lout, cout = params["lout"], params["cout"]

    tb, bpad = _choose_batch_tiling(B)
    n_tiles = bpad // tb

    # bf16 input rows; pad the batch only when the multi-tile path needs it
    # (the single-tile path uses block == full array dims, so no padding).
    xp = xb.astype(jnp.bfloat16)
    if bpad != B:
        xp = jnp.pad(xp, ((0, bpad - B), (0, 0)))

    # Advisory cost hint so XLA schedules this tiny custom call sensibly.
    w_elems = d_in * n1 + n1 * n2 + n2 * nout
    cost = pl.CostEstimate(
        flops=2 * bpad * w_elems,
        transcendentals=bpad * nout,
        bytes_accessed=bpad * d_in * 2 + w_elems * 2 + b123.size * 4
                       + bpad * nout * 2)

    # Explicit VMEM budget: double-buffered blocks + f32 in-kernel temporaries,
    # with generous headroom (total footprint is <1 MiB even at tb=512, far
    # under v7x's 64 MiB physical VMEM).
    blk_bytes = (tb * d_in * 2 + w_elems * 2 + b123.size * 4
                 + tb * nout * 2 + 2 * tb * max(n1, n2) * 4)
    vmem_limit = int(max(8 << 20, 4 * blk_bytes))

    out = pl.pallas_call(
        _fused_decoder_kernel,
        out_shape=jax.ShapeDtypeStruct((bpad, nout), jnp.bfloat16),
        grid=(n_tiles,),
        in_specs=[
            pl.BlockSpec((tb, d_in), lambda i: (i, 0)),
            # Weights / biases: constant index_map -> stay VMEM-resident
            # across batch tiles (no re-DMA between grid steps).
            pl.BlockSpec((d_in, n1), lambda i: (0, 0)),
            pl.BlockSpec((n1, n2), lambda i: (0, 0)),
            pl.BlockSpec((n2, nout), lambda i: (0, 0)),
            pl.BlockSpec(b123.shape, lambda i: (0, 0)),
        ],
        out_specs=pl.BlockSpec((tb, nout), lambda i: (i, 0)),
        compiler_params=pltpu.CompilerParams(
            dimension_semantics=("parallel",),   # v7x: 2 TCs split the batch
            vmem_limit_bytes=vmem_limit),
        cost_estimate=cost,
    )(xp, w1, w2, w3, b123)

    # Tiny valid slice back to f32 (matches the module's f32 output dtype).
    return out[:B].astype(jnp.float32).reshape(B, cout, lout)


# --------------------------- parameter building ---------------------------- #

def _convtranspose1d_matrix(w, l_in, stride, pad):
    """Dense matrix of ConvTranspose1d.

    w: (Cin, Cout, K)  (PyTorch ConvTranspose1d weight layout)
    returns M: (Cin*Lin, Cout*Lout) with channel-major (c, t) flattening, so
    that  y_flat = x_flat @ M  reproduces F.conv_transpose1d exactly.
    """
    c_in, c_out, k = w.shape
    l_out = (l_in - 1) * stride - 2 * pad + k
    m = np.zeros((c_in, l_in, c_out, l_out), dtype=np.float32)
    for i in range(l_in):
        for kk in range(k):
            t = i * stride - pad + kk
            if 0 <= t < l_out:
                m[:, i, :, t] += np.asarray(w[:, :, kk])
    return m.reshape(c_in * l_in, c_out * l_out), l_out


def make_params(key, d_in, c0, l0, c1, cout, k=4, stride=2, pad=1):
    k1, k2, k3, k4, k5, k6 = jax.random.split(key, 6)
    n1 = c0 * l0

    # Linear: Din -> C0*L0
    w1 = np.asarray(jax.random.normal(k1, (d_in, n1), jnp.float32)) / np.sqrt(d_in)
    b1 = 0.01 * np.asarray(jax.random.normal(k2, (n1,), jnp.float32))

    # ConvTranspose1d(C0 -> C1)
    wt2 = np.asarray(jax.random.normal(k3, (c0, c1, k), jnp.float32)) / np.sqrt(c0 * k)
    bias2 = 0.01 * np.asarray(jax.random.normal(k4, (c1,), jnp.float32))
    m2, l1 = _convtranspose1d_matrix(wt2, l0, stride, pad)
    n2 = c1 * l1
    b2 = np.broadcast_to(bias2[:, None], (c1, l1)).reshape(n2)

    # ConvTranspose1d(C1 -> Cout)
    wt3 = np.asarray(jax.random.normal(k5, (c1, cout, k), jnp.float32)) / np.sqrt(c1 * k)
    bias3 = 0.01 * np.asarray(jax.random.normal(k6, (cout,), jnp.float32))
    m3, l_out = _convtranspose1d_matrix(wt3, l1, stride, pad)
    nout = cout * l_out
    b3 = np.broadcast_to(bias3[:, None], (cout, l_out)).reshape(nout)

    # ---- TPU-friendly packing: bf16 weights, all 3 biases in one f32 tile ---
    bw = _round_up(max(n1, n2, nout), LANE)
    b123 = np.zeros((8, bw), np.float32)        # one 8-sublane tile, one DMA
    b123[0, :n1] = b1
    b123[1, :n2] = b2
    b123[2, :nout] = b3

    params = {
        "w1": jnp.asarray(w1, jnp.bfloat16),
        "w2": jnp.asarray(m2, jnp.bfloat16),
        "w3": jnp.asarray(m3, jnp.bfloat16),
        "b123": jnp.asarray(b123, jnp.float32),
        "lout": l_out, "cout": cout,
    }
    return params, l_out


# ------------------------------- reference --------------------------------- #

def reference_forward(x, params):
    """Pure-JAX reference mirroring the kernel's rounding points (bf16 weights,
    bf16-rounded activations/output, f32 accumulation)."""
    xb = jnp.squeeze(x, axis=1)
    B = xb.shape[0]
    w1 = params["w1"].astype(jnp.float32)
    w2 = params["w2"].astype(jnp.float32)
    w3 = params["w3"].astype(jnp.float32)
    b = params["b123"]
    n1, n2, nout = w1.shape[1], w2.shape[1], w3.shape[1]
    lout, cout = params["lout"], params["cout"]

    xp = xb.astype(jnp.bfloat16).astype(jnp.float32)
    h = jnp.maximum(xp @ w1 + b[0:1, :n1], 0.0)
    h = h.astype(jnp.bfloat16).astype(jnp.float32)
    h = jnp.maximum(h @ w2 + b[1:2, :n2], 0.0)
    h = h.astype(jnp.bfloat16).astype(jnp.float32)
    y = jnp.tanh(h @ w3 + b[2:3, :nout])
    y = y.astype(jnp.bfloat16).astype(jnp.float32)
    return y[:, :cout * lout].reshape(B, cout, lout)


# --------------------------------- main ------------------------------------ #

if __name__ == "__main__":
    key = jax.random.PRNGKey(0)
    k_x, k_p = jax.random.split(key)

    # input_params = [{'dim':16}, {'dim':16}] -> Din = 32; decoder: C0=16,L0=8
    # -> C1=8,L1=16 -> Cout=1, Lout=32 (output_params['dim']=32)
    D_IN, C0, L0, C1, COUT = 32, 16, 8, 8, 1
    params, l_out = make_params(k_p, D_IN, C0, L0, C1, COUT)

    for tag, b in (("small_single_tile", 2), ("multi_tile_even_split", 300)):
        x = jax.random.normal(jax.random.fold_in(k_x, b), (b, 1, D_IN),
                              jnp.float32)
        out = jax.block_until_ready(symbol2signal_forward(x, params))
        ref = reference_forward(x, params)
        assert out.shape == (b, 1, l_out), (tag, out.shape)
        np.testing.assert_allclose(np.asarray(out), np.asarray(ref),
                                   rtol=2e-2, atol=2e-2)

    print("KERNEL_OK")
</pallas_src>

<mosaic_0001>
module attributes {stable_mosaic.version = 11 : i64} {
  func.func @_fused_decoder_kernel(%arg0: i32, %arg1: memref<2x32xbf16, #tpu.memory_space<vmem>>, %arg2: memref<32x128xbf16, #tpu.memory_space<vmem>>, %arg3: memref<128x128xbf16, #tpu.memory_space<vmem>>, %arg4: memref<128x32xbf16, #tpu.memory_space<vmem>>, %arg5: memref<8x128xf32, #tpu.memory_space<vmem>>, %arg6: memref<2x32xbf16, #tpu.memory_space<vmem>>) attributes {dimension_semantics = [#tpu.dimension_semantics<parallel>], iteration_bounds = array<i64: 1>, scalar_prefetch = 0 : i64, scratch_operands = 0 : i64, tpu.core_type = #tpu.core_type<tc>, window_params = [{transform_indices = @transform_0, window_bounds = array<i64: 2, 32>}, {pipeline_mode = #tpu.pipeline_mode<synchronous>, transform_indices = @transform_1, window_bounds = array<i64: 32, 128>}, {pipeline_mode = #tpu.pipeline_mode<synchronous>, transform_indices = @transform_2, window_bounds = array<i64: 128, 128>}, {pipeline_mode = #tpu.pipeline_mode<synchronous>, transform_indices = @transform_3, window_bounds = array<i64: 128, 32>}, {pipeline_mode = #tpu.pipeline_mode<synchronous>, transform_indices = @transform_4, window_bounds = array<i64: 8, 128>}, {transform_indices = @transform_5, window_bounds = array<i64: 2, 32>}]} {
    %c0 = arith.constant 0 : index
    %c0_0 = arith.constant 0 : index
    %0 = vector.load %arg1[%c0, %c0_0] : memref<2x32xbf16, #tpu.memory_space<vmem>>, vector<2x32xbf16>
    %c0_1 = arith.constant 0 : index
    %c0_2 = arith.constant 0 : index
    %1 = vector.load %arg2[%c0_1, %c0_2] : memref<32x128xbf16, #tpu.memory_space<vmem>>, vector<32x128xbf16>
    %cst = arith.constant dense<0.000000e+00> : vector<2x128xf32>
    %2 = tpu.matmul %0, %1, %cst {dimension_numbers = #tpu.dot_dimension_numbers<[1], [0], [0], [1], [0, 0, 1, 1], [], []>} : vector<2x32xbf16>, vector<32x128xbf16>, vector<2x128xf32> -> vector<2x128xf32>
    %c0_3 = arith.constant 0 : index
    %c0_4 = arith.constant 0 : index
    %3 = vector.load %arg5[%c0_3, %c0_4] : memref<8x128xf32, #tpu.memory_space<vmem>>, vector<1x128xf32>
    %4 = vector.broadcast %3 : vector<1x128xf32> to vector<2x128xf32>
    %5 = arith.addf %2, %4 : vector<2x128xf32>
    %cst_5 = arith.constant 0.000000e+00 : f32
    %6 = vector.broadcast %cst_5 : f32 to vector<2x128xf32>
    %7 = arith.maximumf %5, %6 : vector<2x128xf32>
    %8 = arith.truncf %7 : vector<2x128xf32> to vector<2x128xbf16>
    %c0_6 = arith.constant 0 : index
    %c0_7 = arith.constant 0 : index
    %9 = vector.load %arg3[%c0_6, %c0_7] : memref<128x128xbf16, #tpu.memory_space<vmem>>, vector<128x128xbf16>
    %cst_8 = arith.constant dense<0.000000e+00> : vector<2x128xf32>
    %10 = tpu.matmul %8, %9, %cst_8 {dimension_numbers = #tpu.dot_dimension_numbers<[1], [0], [0], [1], [0, 0, 1, 1], [], []>} : vector<2x128xbf16>, vector<128x128xbf16>, vector<2x128xf32> -> vector<2x128xf32>
    %c1 = arith.constant 1 : index
    %c0_9 = arith.constant 0 : index
    %11 = vector.load %arg5[%c1, %c0_9] : memref<8x128xf32, #tpu.memory_space<vmem>>, vector<1x128xf32>
    %12 = vector.broadcast %11 : vector<1x128xf32> to vector<2x128xf32>
    %13 = arith.addf %10, %12 : vector<2x128xf32>
    %cst_10 = arith.constant 0.000000e+00 : f32
    %14 = vector.broadcast %cst_10 : f32 to vector<2x128xf32>
    %15 = arith.maximumf %13, %14 : vector<2x128xf32>
    %16 = arith.truncf %15 : vector<2x128xf32> to vector<2x128xbf16>
    %c0_11 = arith.constant 0 : index
    %c0_12 = arith.constant 0 : index
    %17 = vector.load %arg4[%c0_11, %c0_12] : memref<128x32xbf16, #tpu.memory_space<vmem>>, vector<128x32xbf16>
    %cst_13 = arith.constant dense<0.000000e+00> : vector<2x32xf32>
    %18 = tpu.matmul %16, %17, %cst_13 {dimension_numbers = #tpu.dot_dimension_numbers<[1], [0], [0], [1], [0, 0, 1, 1], [], []>} : vector<2x128xbf16>, vector<128x32xbf16>, vector<2x32xf32> -> vector<2x32xf32>
    %c2 = arith.constant 2 : index
    %c0_14 = arith.constant 0 : index
    %19 = vector.load %arg5[%c2, %c0_14] : memref<8x128xf32, #tpu.memory_space<vmem>>, vector<1x32xf32>
    %20 = vector.broadcast %19 : vector<1x32xf32> to vector<2x32xf32>
    %21 = arith.addf %18, %20 : vector<2x32xf32>
    %22 = math.tanh %21 : vector<2x32xf32>
    %23 = arith.truncf %22 : vector<2x32xf32> to vector<2x32xbf16>
    %c0_15 = arith.constant 0 : index
    %c0_16 = arith.constant 0 : index
    %24 = vector.load %arg6[%c0_15, %c0_16] : memref<2x32xbf16, #tpu.memory_space<vmem>>, vector<2x32xbf16>
    tpu.vector_store %arg6[%c0_15, %c0_16], %23 {strides = array<i32>} : memref<2x32xbf16, #tpu.memory_space<vmem>>, vector<2x32xbf16>,
    return
  }
  func.func @transform_0(%arg0: i32) -> (i32, i32) {
    %c0_i32 = arith.constant 0 : i32
    %c0_i32_0 = arith.constant 0 : i32
    return %arg0, %c0_i32 : i32, i32
  }
  func.func @transform_1(%arg0: i32) -> (i32, i32) {
    %c0_i32 = arith.constant 0 : i32
    %c0_i32_0 = arith.constant 0 : i32
    %c0_i32_1 = arith.constant 0 : i32
    return %c0_i32, %c0_i32_0 : i32, i32
  }
  func.func @transform_2(%arg0: i32) -> (i32, i32) {
    %c0_i32 = arith.constant 0 : i32
    %c0_i32_0 = arith.constant 0 : i32
    %c0_i32_1 = arith.constant 0 : i32
    return %c0_i32, %c0_i32_0 : i32, i32
  }
  func.func @transform_3(%arg0: i32) -> (i32, i32) {
    %c0_i32 = arith.constant 0 : i32
    %c0_i32_0 = arith.constant 0 : i32
    %c0_i32_1 = arith.constant 0 : i32
    return %c0_i32, %c0_i32_0 : i32, i32
  }
  func.func @transform_4(%arg0: i32) -> (i32, i32) {
    %c0_i32 = arith.constant 0 : i32
    %c0_i32_0 = arith.constant 0 : i32
    %c0_i32_1 = arith.constant 0 : i32
    return %c0_i32, %c0_i32_0 : i32, i32
  }
  func.func @transform_5(%arg0: i32) -> (i32, i32) {
    %c0_i32 = arith.constant 0 : i32
    %c0_i32_0 = arith.constant 0 : i32
    return %arg0, %c0_i32 : i32, i32
  }
}

</mosaic_0001>

<bundles_post_ra>
// kernel: tpu_custom_call.1
= control target key start
LH: loop header
LB: loop body
LE: loop exit
PB: predicated region body
PF: predicated region fallthrough
CT: control target
= control target key end

     0   :  { %v466_v1 = vmov 0.0   ;;  %vm467_vm0 = vmmov 0   ;;  %vm44_vm1 = vcmask 261120   ;;  %s601_s0 = inlined_call_operand.vmem [shape: bf16[2,32], index: 0, kind: input, shape index: {}]   ;;  %s602_s1 = inlined_call_operand.vmem [shape: bf16[32,128], index: 1, kind: input, shape index: {}]   ;;  %s603_s2 = inlined_call_operand.vmem [shape: bf16[128,128], index: 2, kind: input, shape index: {}]   ;;  %s604_s3 = inlined_call_operand.vmem [shape: bf16[128,32], index: 3, kind: input, shape index: {}]   ;;  %s605_s4 = inlined_call_operand.vmem [shape: f32[8,128], index: 4, kind: input, shape index: {}]   ;;  %s606_s5 = inlined_call_operand.hbm [shape: bf16[2,32], index: 5, kind: output, shape index: {}]  }
   0x1   :  { %v422_v0 = vld [vmem:[%s602_s1] sm:$0xff]   ;;  %371 = vmatprep.subr.bf16.mxu0 %v466_v1  ;;  %379 = vmatprep.subr.bf16.mxu1 %v466_v1  ;;  %v423_v2 = vld [vmem:[%s602_s1 + $0x8] sm:$0xff]   ;;  %v426_v6 = vld [vmem:[%s603_s2 + $0x10] sm:$0xff]  }
   0x2   :  { %372 = vmatpush3.bf16.msra.mxu0 %v422_v0  ;;  %375 = vmatprep.mubr.msk.bf16.mxu0 %vm467_vm0, %v466_v1  ;;  %v424_v3 = vld [vmem:[%s603_s2] sm:$0xff]   ;;  %v425_v4 = vld [vmem:[%s603_s2 + $0x8] sm:$0xff]   ;;  %v427_v7 = vld [vmem:[%s603_s2 + $0x18] sm:$0xff]  }
   0x3   :  { %373 = vmatprep.subr.bf16.mxu0 %v466_v1  ;;  %395 = vmatprep.mubr.msk.bf16.mxu1 %vm467_vm0, %v466_v1  ;;  %v22_v5 = vld [vmem:[%s601_s0] sm:$0x1] }
   0x4   :  { %380 = vmatpush3.bf16.msra.mxu1 %v424_v3 }
   0x5   :  { %381 = vmatprep.subr.bf16.mxu1 %v466_v1 }
   0x6   :  { %374 = vmatpush3.bf16.msra.mxu0 %v423_v2 }
   0x7   :  { %399 = vmatprep.subr.bf16.mxu0 %v466_v1 }
   0x8   :  { %382 = vmatpush3.bf16.msra.mxu1 %v425_v4 }
   0x9   :  { %376 = vmatmul.mubr.msk.bf16.vlgmr.msra.gmra.mrb[0].mxu0 %vm44_vm1, %v22_v5  ;;  %383 = vmatprep.subr.bf16.mxu1 %v466_v1 }
   0xa   :  { %415 = vmatprep.mubr.msk.bf16.mxu0 %vm467_vm0, %v466_v1 }
   0xc   :  { %384 = vmatpush3.bf16.msra.mxu1 %v426_v6 }
   0xd   :  { %385 = vmatprep.subr.bf16.mxu1 %v466_v1 }
   0xe   :  { %10 = vsyncpa [#allocation3], 0  ;;  %v428_v8 = vld [vmem:[%s603_s2 + $0x20] sm:$0xff]   ;;  %v429_v9 = vld [vmem:[%s603_s2 + $0x28] sm:$0xff]   ;;  %vm312_vm2 = vcmask 253952  }
   0xf   :  { %v430_v10 = vld [vmem:[%s603_s2 + $0x30] sm:$0xff]   ;;  %v431_v11 = vld [vmem:[%s603_s2 + $0x38] sm:$0xff]   ;;  %v432_v12 = vld [vmem:[%s604_s3] sm:$0xff]  }
  0x10   :  { %386 = vmatpush3.bf16.msra.mxu1 %v427_v7  ;;  %400 = vmatpush3.bf16.msra.mxu0 %v432_v12  ;;  %v433_v13 = vld [vmem:[%s604_s3 + $0x8] sm:$0xff]   ;;  %v434_v14 = vld [vmem:[%s604_s3 + $0x10] sm:$0xff]   ;;  %v435_v15 = vld [vmem:[%s604_s3 + $0x18] sm:$0xff]  }
  0x11   :  { %387 = vmatprep.subr.bf16.mxu1 %v466_v1  ;;  %401 = vmatprep.subr.bf16.mxu0 %v466_v1  ;;  %v436_v16 = vld [vmem:[%s604_s3 + $0x20] sm:$0xff]   ;;  %v437_v17 = vld [vmem:[%s604_s3 + $0x28] sm:$0xff]   ;;  %v438_v26 = vld [vmem:[%s604_s3 + $0x30] sm:$0xff]  }
  0x12   :  { %v328_v18 = vld [vmem:[%s605_s4] ss:$0 sm:$0xff]  ;;  %v439_v27 = vld [vmem:[%s604_s3 + $0x38] sm:$0xff]   ;;  %v332_v28 = vld [vmem:[%s605_s4 + $0x1] ss:$0 sm:$0xff]  ;;  %s468_s3 = smov [#allocation2]  }
  0x13   :  { %v341_v36 = vld [vmem:[%s605_s4 + $0x2] ss:$0 sm:$0xff]  ;;  %s320_s7 = sshll.u32 %s468_s3, 4  ;;  %s321_s7 = int_to_ptr.vmem [resolvable:$true] %s320_s7 }
  0x14   :  { %388 = vmatpush3.bf16.msra.mxu1 %v428_v8  ;;  %402 = vmatpush3.bf16.msra.mxu0 %v433_v13  ;;  %s442_s8 = scalar_lea.vmem %s321_s7, 16  ;;  %s446_s9 = scalar_lea.vmem %s321_s7, 32 }
  0x15   :  { %389 = vmatprep.subr.bf16.mxu1 %v466_v1  ;;  %403 = vmatprep.subr.bf16.mxu0 %v466_v1  ;;  %p443_p0 = scmp.ne.s32.totalorder %s321_s7, %s442_s8  ;;  %p447_p1 = scmp.lt.s32.totalorder %s321_s7, %s321_s7 }
  0x16   :  { %p448_p2 = scmp.lt.s32.totalorder %s446_s9, %s442_s8 }
  0x18   :  { %390 = vmatpush3.bf16.msra.mxu1 %v429_v9  ;;  %404 = vmatpush3.bf16.msra.mxu0 %v434_v14  ;;  %p449_p3 = por %p448_p2, %p447_p1 }
  0x19   :  { %391 = vmatprep.subr.bf16.mxu1 %v466_v1  ;;  %405 = vmatprep.subr.bf16.mxu0 %v466_v1 }
  0x1a   :  { %p450_p4 = pnand %p449_p3, %p443_p0 }
  0x1c   :  { %392 = vmatpush3.bf16.msra.mxu1 %v430_v10  ;;  %406 = vmatpush3.bf16.msra.mxu0 %v435_v15 }
  0x1d   :  { %393 = vmatprep.subr.bf16.mxu1 %v466_v1  ;;  %407 = vmatprep.subr.bf16.mxu0 %v466_v1 }
  0x20   :  { %394 = vmatpush3.bf16.msra.mxu1 %v431_v11  ;;  %408 = vmatpush3.bf16.msra.mxu0 %v436_v16 }
  0x21   :  { %409 = vmatprep.subr.bf16.mxu0 %v466_v1 }
  0x24   :  { %410 = vmatpush3.bf16.msra.mxu0 %v437_v17 }
  0x25   :  { %411 = vmatprep.subr.bf16.mxu0 %v466_v1 }
  0x28   :  { %412 = vmatpush3.bf16.msra.mxu0 %v438_v26 }
  0x29   :  { %413 = vmatprep.subr.bf16.mxu0 %v466_v1 }
  0x2c   :  { %414 = vmatpush3.bf16.msra.mxu0 %v439_v27 }
  0xdc   :  { %v82_v19 = vpop.f32.mrb[0].mxu0 }
  0xdd   :  { %v83_v20 = vadd.f32 %v328_v18, %v82_v19  ;;  %v377_v21 = vpop.f32.mrb[1].mxu0 }
  0xde   :  { %v85_v22 = vpop.f32.mrb[2].mxu0 }
  0xdf   :  { %v88_v23 = vmax.f32 %v83_v20, 0.0  ;;  %v378_v24 = vpop.f32.mrb[3].mxu0 }
  0xe1   :  { %v89_v25 = vpack.c.bf16 %v88_v23, %v88_v23 }
  0xe3   :  { %396 = vmatmul.mubr.bf16.vlgmr.msra.gmra.mrb[0].mxu1 %v89_v25 }
 0x1b6   :  { %v193_v29 = vpop.f32.mrb[0].mxu1 }
 0x1b7   :  { %v194_v30 = vadd.f32 %v332_v28, %v193_v29  ;;  %v397_v31 = vpop.f32.mrb[1].mxu1 }
 0x1b8   :  { %v196_v32 = vpop.f32.mrb[2].mxu1 }
 0x1b9   :  { %v199_v33 = vmax.f32 %v194_v30, 0.0  ;;  %v398_v34 = vpop.f32.mrb[3].mxu1 }
 0x1bb   :  { %v200_v35 = vpack.c.bf16 %v199_v33, %v199_v33 }
 0x1bd   :  { %416 = vmatmul.mubr.bf16.vlgmr.msra.gmra.mrb[4].mxu0 %v200_v35 }
 0x290   :  { %v304_v37 = vpop.f32.mrb[4].mxu0 }
 0x291   :  { %v305_v38 = vadd.f32 %v341_v36, %v304_v37  ;;  %v417_v39 = vpop.f32.mrb[5].mxu0 }
 0x292   :  { %v307_v40 = vpop.f32.mrb[6].mxu0 }
 0x293   :  { %440 = vtanh.f32 %v305_v38  ;;  %v418_v41 = vpop.f32.mrb[7].mxu0 }
 0x29d   :  { %v441_v42 = vpop.eup %440 }
 0x29e   :  { %v311_v43 = vpack.c.bf16 %v441_v42, %v441_v42 }
 0x2a0   :  { %313 = vst.msk [vmem:[#allocation2] sm:$0x1] %vm312_vm2, %v311_v43 }
 0x2a1   :  { %453 = shalt.err (!%p450_p4)
}
 0x2a2   :  { %s454_s11 = scalar_lea.hbm %s606_s5, 16 }
 0x2a3   :  { %p455_p5 = scmp.ne.s32.totalorder %s606_s5, %s454_s11  ;;  %p458_p6 = scmp.lt.u32.totalorder %s454_s11, %s606_s5 }
 0x2a5   :  { %p460_p7 = pnand %p458_p6, %p455_p5 }
 0x2a7   :  { %463 = shalt.err (!%p460_p7)
}
 0x2a8   :  { %323 = dma.vmem_to_hbm [thread:$0]  %s321_s7, 16, %s606_s5, [#allocation3]  }
 0x2a9   :  { %464 = dma.done.wait [#allocation3], 16  }
 0x2aa   :  { %465 = vsyncadd [#allocation3], 4294967280 }
 0x2ab   :  { %327 = vsyncpa [#allocation3], 1 }

</bundles_post_ra>
